<compile_context>
chip_gen: v5e
topology: v5e:2x2
jax: 0.10.0
libtpu: 0.0.40
codegen_flags: <defaults>
</compile_context>

<pallas_src>
import jax
import jax.numpy as jnp
from jax.experimental import pallas as pl
from jax.experimental.pallas import tpu as pltpu


def _round_up(x: int, m: int) -> int:
    return (x + m - 1) // m * m


def critic_kernel(obs_ref, w1_ref, b1_ref, a1_ref,
                  w2_ref, b2_ref, a2_ref,
                  w3_ref, b3_ref, out_ref):
    # obs tile: (obs_dim, tile_b)  -- batch on lanes, features on sublanes.
    x = obs_ref[...]

    # ---- Linear(obs_dim, H) + Dropout(identity, eval) + PReLU ----
    # (H, obs_dim) @ (obs_dim, tile_b) -> (H, tile_b)
    h1 = jnp.dot(w1_ref[...], x, preferred_element_type=jnp.float32) + b1_ref[...]
    a1 = a1_ref[0]                                   # scalar from SMEM
    h1 = jnp.where(h1 > 0, h1, a1 * h1)              # PReLU

    # ---- Linear(H, H) + Dropout(identity, eval) + PReLU ----
    h2 = jnp.dot(w2_ref[...], h1, preferred_element_type=jnp.float32) + b2_ref[...]
    a2 = a2_ref[0]                                   # scalar from SMEM
    h2 = jnp.where(h2 > 0, h2, a2 * h2)              # PReLU

    # ---- Linear(H, 1): VPU broadcast-multiply + cross-sublane (XLU) reduction ----
    # w3 is a (H, 1) column; result is lane-dense (1, tile_b).
    v = jnp.sum(h2 * w3_ref[...], axis=0, keepdims=True) + b3_ref[0]
    out_ref[...] = v

    # TODO(synk): torch.nn.Dropout in training mode (stochastic masking) is not
    # reproduced; this kernel implements eval-mode (identity) dropout.


def critic_forward(obs, params, *, tile_b: int | None = None):
    """obs: (B, obs_dim) f32. Returns (B,) f32, matching torch.squeeze(critic(obs), -1)."""
    (w1, b1, a1, w2, b2, a2, w3, b3) = params
    B, obs_dim = obs.shape
    H = w1.shape[0]

    # Batch tile on the lane axis: multiple of 128.  Auto-pick so the grid has ~4
    # steps (>=2 keeps both v7x TensorCores busy, few steps amortize the ~0.35us
    # per-step overhead), capped at 16384 rows (still only ~1 MiB/obs buffer).
    if tile_b is None:
        tile_b = _round_up(max(1, pl.cdiv(B, 4)), 128)
    else:
        tile_b = _round_up(max(1, tile_b), 128)
    tile_b = max(128, min(tile_b, 16384))

    Bp = _round_up(B, tile_b)
    grid = (Bp // tile_b,)

    # Batch-on-lanes layout: one XLA transpose (+zero-pad) in the wrapper.
    obs_t = obs.T
    if Bp != B:
        obs_t = jnp.pad(obs_t, ((0, 0), (0, Bp - B)))   # padded columns: zeros -> no NaNs

    # Advisory cost estimate (tiny, latency-bound kernel; helps XLA overlap it).
    flops = 2 * Bp * (obs_dim * H + H * H + H)
    bytes_accessed = 4 * (Bp * obs_dim + w1.size + b1.size + w2.size + b2.size
                          + w3.size + a1.size + a2.size + b3.size + Bp)
    cost = pl.CostEstimate(flops=int(flops), transcendentals=0,
                           bytes_accessed=int(bytes_accessed))

    smem = pltpu.MemorySpace.SMEM

    out = pl.pallas_call(
        critic_kernel,
        out_shape=jax.ShapeDtypeStruct((1, Bp), jnp.float32),
        grid=grid,
        in_specs=[
            # obs (feature-major): pipelined batch tile, double-buffered by Pallas.
            pl.BlockSpec((obs_dim, tile_b), lambda i: (0, i)),
            # Weights/biases: constant block index -> stay resident in VMEM.
            pl.BlockSpec((H, obs_dim), lambda i: (0, 0)),              # W1 (out, in)
            pl.BlockSpec((H, 1), lambda i: (0, 0)),                    # b1 column
            pl.BlockSpec((1,), lambda i: (0,), memory_space=smem),     # PReLU a1 (scalar)
            pl.BlockSpec((H, H), lambda i: (0, 0)),                    # W2 (out, in)
            pl.BlockSpec((H, 1), lambda i: (0, 0)),                    # b2 column
            pl.BlockSpec((1,), lambda i: (0,), memory_space=smem),     # PReLU a2 (scalar)
            pl.BlockSpec((H, 1), lambda i: (0, 0)),                    # W3 as (H, 1) column
            pl.BlockSpec((1,), lambda i: (0,), memory_space=smem),     # b3 (scalar)
        ],
        # Lane-dense output: (1, tile_b) blocks of a (1, Bp) row.
        out_specs=pl.BlockSpec((1, tile_b), lambda i: (0, i)),
        compiler_params=pltpu.CompilerParams(
            dimension_semantics=("parallel",)),
        cost_estimate=cost,
    )(obs_t, w1, b1, a1, w2, b2, a2, w3, b3)

    return out[0, :B]


def init_params(key, obs_dim, hidden_dim):
    """Deterministic init mirroring PyTorch default Linear init (U[-1/sqrt(fan_in), +])
    and PReLU(init=0.25).  Linear weights are stored (out, in) for the feature-major
    kernel; the output-layer weight is stored as an (H, 1) column for the in-kernel
    VPU multiply + sublane reduction."""
    ks = jax.random.split(key, 6)

    def lin(kw, kb, fan_in, fan_out):
        bound = 1.0 / jnp.sqrt(fan_in)
        w = jax.random.uniform(kw, (fan_out, fan_in), jnp.float32, -bound, bound)
        b = jax.random.uniform(kb, (fan_out, 1), jnp.float32, -bound, bound)
        return w, b

    w1, b1 = lin(ks[0], ks[1], obs_dim, hidden_dim)        # (H, obs_dim), (H, 1)
    w2, b2 = lin(ks[2], ks[3], hidden_dim, hidden_dim)     # (H, H), (H, 1)
    w3_row, b3_row = lin(ks[4], ks[5], hidden_dim, 1)      # (1, H), (1, 1)
    w3 = w3_row.T                                          # (H, 1) column
    b3 = b3_row.reshape(1)                                 # (1,) scalar array (SMEM)
    a1 = jnp.full((1,), 0.25, jnp.float32)                 # PReLU weight (single-param default)
    a2 = jnp.full((1,), 0.25, jnp.float32)
    return (w1, b1, a1, w2, b2, a2, w3, b3)


def critic_reference(obs, params):
    """Pure-JAX reference of the same forward pass (eval-mode dropout)."""
    (w1, b1, a1, w2, b2, a2, w3, b3) = params
    h1 = obs @ w1.T + b1[:, 0]
    h1 = jnp.where(h1 > 0, h1, a1[0] * h1)
    h2 = h1 @ w2.T + b2[:, 0]
    h2 = jnp.where(h2 > 0, h2, a2[0] * h2)
    v = h2 @ w3[:, 0] + b3[0]
    return v


if __name__ == "__main__":
    obs_dim, hidden_dim, batch = 16, 32, 20   # batch not a multiple of 128: exercises padding

    key = jax.random.PRNGKey(0)
    k_obs, k_param = jax.random.split(key)
    obs = jax.random.normal(k_obs, (batch, obs_dim), jnp.float32)
    params = init_params(k_param, obs_dim, hidden_dim)

    out = critic_forward(obs, params)         # auto tile_b -> 128, single grid step here
    jax.block_until_ready(out)

    ref = critic_reference(obs, params)
    assert out.shape == (batch,), out.shape
    assert jnp.allclose(out, ref, atol=1e-4, rtol=1e-4), (out, ref)

    print("KERNEL_OK")
</pallas_src>

<mosaic_0001>
module attributes {stable_mosaic.version = 11 : i64} {
  func.func @critic_kernel(%arg0: i32, %arg1: memref<16x128xf32, #tpu.memory_space<vmem>>, %arg2: memref<32x16xf32, #tpu.memory_space<vmem>>, %arg3: memref<32x1xf32, #tpu.memory_space<vmem>>, %arg4: memref<1xf32, #tpu.memory_space<smem>>, %arg5: memref<32x32xf32, #tpu.memory_space<vmem>>, %arg6: memref<32x1xf32, #tpu.memory_space<vmem>>, %arg7: memref<1xf32, #tpu.memory_space<smem>>, %arg8: memref<32x1xf32, #tpu.memory_space<vmem>>, %arg9: memref<1xf32, #tpu.memory_space<smem>>, %arg10: memref<1x128xf32, #tpu.memory_space<vmem>>) attributes {dimension_semantics = [#tpu.dimension_semantics<parallel>], iteration_bounds = array<i64: 1>, scalar_prefetch = 0 : i64, scratch_operands = 0 : i64, tpu.core_type = #tpu.core_type<tc>, window_params = [{transform_indices = @transform_0, window_bounds = array<i64: 16, 128>}, {pipeline_mode = #tpu.pipeline_mode<synchronous>, transform_indices = @transform_1, window_bounds = array<i64: 32, 16>}, {pipeline_mode = #tpu.pipeline_mode<synchronous>, transform_indices = @transform_2, window_bounds = array<i64: 32, 1>}, {transform_indices = @transform_3, window_bounds = array<i64: 1>}, {pipeline_mode = #tpu.pipeline_mode<synchronous>, transform_indices = @transform_4, window_bounds = array<i64: 32, 32>}, {pipeline_mode = #tpu.pipeline_mode<synchronous>, transform_indices = @transform_5, window_bounds = array<i64: 32, 1>}, {transform_indices = @transform_6, window_bounds = array<i64: 1>}, {pipeline_mode = #tpu.pipeline_mode<synchronous>, transform_indices = @transform_7, window_bounds = array<i64: 32, 1>}, {transform_indices = @transform_8, window_bounds = array<i64: 1>}, {transform_indices = @transform_9, window_bounds = array<i64: 1, 128>}]} {
    %c0 = arith.constant 0 : index
    %c0_0 = arith.constant 0 : index
    %0 = vector.load %arg1[%c0, %c0_0] : memref<16x128xf32, #tpu.memory_space<vmem>>, vector<16x128xf32>
    %c0_1 = arith.constant 0 : index
    %c0_2 = arith.constant 0 : index
    %1 = vector.load %arg2[%c0_1, %c0_2] : memref<32x16xf32, #tpu.memory_space<vmem>>, vector<32x16xf32>
    %cst = arith.constant dense<0.000000e+00> : vector<32x128xf32>
    %2 = tpu.matmul %1, %0, %cst {dimension_numbers = #tpu.dot_dimension_numbers<[1], [0], [0], [1], [0, 0, 1, 1], [], []>} : vector<32x16xf32>, vector<16x128xf32>, vector<32x128xf32> -> vector<32x128xf32>
    %c0_3 = arith.constant 0 : index
    %c0_4 = arith.constant 0 : index
    %3 = vector.load %arg3[%c0_3, %c0_4] : memref<32x1xf32, #tpu.memory_space<vmem>>, vector<32x1xf32>
    %4 = vector.broadcast %3 : vector<32x1xf32> to vector<32x128xf32>
    %5 = arith.addf %2, %4 : vector<32x128xf32>
    %c0_5 = arith.constant 0 : index
    %6 = memref.load %arg4[%c0_5] : memref<1xf32, #tpu.memory_space<smem>>
    %cst_6 = arith.constant 0.000000e+00 : f32
    %7 = vector.broadcast %cst_6 : f32 to vector<32x128xf32>
    %8 = arith.cmpf ogt, %5, %7 : vector<32x128xf32>
    %9 = vector.broadcast %6 : f32 to vector<32x128xf32>
    %10 = arith.mulf %9, %5 : vector<32x128xf32>
    %11 = arith.select %8, %5, %10 : vector<32x128xi1>, vector<32x128xf32>
    %c0_7 = arith.constant 0 : index
    %c0_8 = arith.constant 0 : index
    %12 = vector.load %arg5[%c0_7, %c0_8] : memref<32x32xf32, #tpu.memory_space<vmem>>, vector<32x32xf32>
    %cst_9 = arith.constant dense<0.000000e+00> : vector<32x128xf32>
    %13 = tpu.matmul %12, %11, %cst_9 {dimension_numbers = #tpu.dot_dimension_numbers<[1], [0], [0], [1], [0, 0, 1, 1], [], []>} : vector<32x32xf32>, vector<32x128xf32>, vector<32x128xf32> -> vector<32x128xf32>
    %c0_10 = arith.constant 0 : index
    %c0_11 = arith.constant 0 : index
    %14 = vector.load %arg6[%c0_10, %c0_11] : memref<32x1xf32, #tpu.memory_space<vmem>>, vector<32x1xf32>
    %15 = vector.broadcast %14 : vector<32x1xf32> to vector<32x128xf32>
    %16 = arith.addf %13, %15 : vector<32x128xf32>
    %c0_12 = arith.constant 0 : index
    %17 = memref.load %arg7[%c0_12] : memref<1xf32, #tpu.memory_space<smem>>
    %cst_13 = arith.constant 0.000000e+00 : f32
    %18 = vector.broadcast %cst_13 : f32 to vector<32x128xf32>
    %19 = arith.cmpf ogt, %16, %18 : vector<32x128xf32>
    %20 = vector.broadcast %17 : f32 to vector<32x128xf32>
    %21 = arith.mulf %20, %16 : vector<32x128xf32>
    %22 = arith.select %19, %16, %21 : vector<32x128xi1>, vector<32x128xf32>
    %c0_14 = arith.constant 0 : index
    %c0_15 = arith.constant 0 : index
    %23 = vector.load %arg8[%c0_14, %c0_15] : memref<32x1xf32, #tpu.memory_space<vmem>>, vector<32x1xf32>
    %24 = vector.broadcast %23 : vector<32x1xf32> to vector<32x128xf32>
    %25 = arith.mulf %22, %24 : vector<32x128xf32>
    %cst_16 = arith.constant dense<0.000000e+00> : vector<128xf32>
    %26 = vector.multi_reduction <add>, %25, %cst_16 [0] : vector<32x128xf32> to vector<128xf32>
    %27 = vector.shape_cast %26 : vector<128xf32> to vector<1x128xf32>
    %c0_17 = arith.constant 0 : index
    %28 = memref.load %arg9[%c0_17] : memref<1xf32, #tpu.memory_space<smem>>
    %29 = vector.broadcast %28 : f32 to vector<1x128xf32>
    %30 = arith.addf %27, %29 : vector<1x128xf32>
    %c0_18 = arith.constant 0 : index
    %c0_19 = arith.constant 0 : index
    %31 = vector.load %arg10[%c0_18, %c0_19] : memref<1x128xf32, #tpu.memory_space<vmem>>, vector<1x128xf32>
    tpu.vector_store %arg10[%c0_18, %c0_19], %30 {strides = array<i32>} : memref<1x128xf32, #tpu.memory_space<vmem>>, vector<1x128xf32>,
    return
  }
  func.func @transform_0(%arg0: i32) -> (i32, i32) {
    %c0_i32 = arith.constant 0 : i32
    %c0_i32_0 = arith.constant 0 : i32
    return %c0_i32, %arg0 : i32, i32
  }
  func.func @transform_1(%arg0: i32) -> (i32, i32) {
    %c0_i32 = arith.constant 0 : i32
    %c0_i32_0 = arith.constant 0 : i32
    %c0_i32_1 = arith.constant 0 : i32
    return %c0_i32, %c0_i32_0 : i32, i32
  }
  func.func @transform_2(%arg0: i32) -> (i32, i32) {
    %c0_i32 = arith.constant 0 : i32
    %c0_i32_0 = arith.constant 0 : i32
    %c0_i32_1 = arith.constant 0 : i32
    return %c0_i32, %c0_i32_0 : i32, i32
  }
  func.func @transform_3(%arg0: i32) -> i32 {
    %c0_i32 = arith.constant 0 : i32
    %c0_i32_0 = arith.constant 0 : i32
    return %c0_i32 : i32
  }
  func.func @transform_4(%arg0: i32) -> (i32, i32) {
    %c0_i32 = arith.constant 0 : i32
    %c0_i32_0 = arith.constant 0 : i32
    %c0_i32_1 = arith.constant 0 : i32
    return %c0_i32, %c0_i32_0 : i32, i32
  }
  func.func @transform_5(%arg0: i32) -> (i32, i32) {
    %c0_i32 = arith.constant 0 : i32
    %c0_i32_0 = arith.constant 0 : i32
    %c0_i32_1 = arith.constant 0 : i32
    return %c0_i32, %c0_i32_0 : i32, i32
  }
  func.func @transform_6(%arg0: i32) -> i32 {
    %c0_i32 = arith.constant 0 : i32
    %c0_i32_0 = arith.constant 0 : i32
    return %c0_i32 : i32
  }
  func.func @transform_7(%arg0: i32) -> (i32, i32) {
    %c0_i32 = arith.constant 0 : i32
    %c0_i32_0 = arith.constant 0 : i32
    %c0_i32_1 = arith.constant 0 : i32
    return %c0_i32, %c0_i32_0 : i32, i32
  }
  func.func @transform_8(%arg0: i32) -> i32 {
    %c0_i32 = arith.constant 0 : i32
    %c0_i32_0 = arith.constant 0 : i32
    return %c0_i32 : i32
  }
  func.func @transform_9(%arg0: i32) -> (i32, i32) {
    %c0_i32 = arith.constant 0 : i32
    %c0_i32_0 = arith.constant 0 : i32
    return %c0_i32, %arg0 : i32, i32
  }
}

</mosaic_0001>

<bundles_post_ra>
// kernel: tpu_custom_call.1
= control target key start
LH: loop header
LB: loop body
LE: loop exit
PB: predicated region body
PF: predicated region fallthrough
CT: control target
= control target key end

     0   :  { %vm66_vm0 = vcmask 130048   ;;  %v308_v3 = vmov 0   ;;  %s442_s0 = inlined_call_operand.vmem [shape: f32[16,128], index: 0, kind: input, shape index: {}]   ;;  %s443_s1 = inlined_call_operand.vmem [shape: f32[32,16], index: 1, kind: input, shape index: {}]   ;;  %s444_s2 = inlined_call_operand.vmem [shape: f32[32,1], index: 2, kind: input, shape index: {}]   ;;  %s445_s3 = inlined_call_operand.<no memory space> [shape: f32[1], index: 3, kind: input, shape index: {}]   ;;  %s446_s4 = inlined_call_operand.vmem [shape: f32[32,32], index: 4, kind: input, shape index: {}]   ;;  %s447_s5 = inlined_call_operand.vmem [shape: f32[32,1], index: 5, kind: input, shape index: {}]   ;;  %s448_s6 = inlined_call_operand.<no memory space> [shape: f32[1], index: 6, kind: input, shape index: {}]   ;;  %s449_s7 = inlined_call_operand.vmem [shape: f32[32,1], index: 7, kind: input, shape index: {}]   ;;  %s450_s8 = inlined_call_operand.<no memory space> [shape: f32[1], index: 8, kind: input, shape index: {}]   ;;  %s451_s9 = inlined_call_operand.hbm [shape: f32[1,128], index: 9, kind: output, shape index: {}]  }
   0x1   :  { %v37_v0 = vld [vmem:[%s442_s0 + $0x8] sm:$0xff]  ;;  %v36_v1 = vld [vmem:[%s442_s0] sm:$0xff]  ;;  %279 = vset.pattern.permute.xlu0 %v308_v3  ;;  %v45_v4 = vld [vmem:[%s444_s2 + $0x18] sm:$0xff]  ;;  %280 = vset.pattern.permute.xlu1 %v308_v3 }
   0x2   :  { %271 = vmatpush.msra.mxu3 %v37_v0  ;;  %v39_v2 = vld [vmem:[%s443_s1 + $0x8] sm:$0xff]  ;;  %63 = vperm.xlu0 %279, %v45_v4   ;;  %v38_v6 = vld [vmem:[%s443_s1] sm:$0xff] }
   0x3   :  { %v43_v5 = vld [vmem:[%s444_s2 + $0x8] sm:$0xff]  ;;  %93 = vmatpush.msra.mxu0 %v37_v0 }
   0x4   :  { %272 = vmatpush.msra.mxu3 %v36_v1  ;;  %53 = vperm.xlu1 %280, %v43_v5  }
   0x5   :  { %264 = vmatmul.msk.f32.vlgmr.msra.gmra.mxu3 %vm66_vm0, %v39_v2 }
   0x6   :  { %17 = vsyncpa [#allocation6], 0  ;;  %281 = vset.pattern.permute.xlu2 %v308_v3  ;;  %94 = vmatpush.msra.mxu0 %v36_v1  ;;  %v44_v7 = vld [vmem:[%s444_s2 + $0x10] sm:$0xff]  ;;  %v42_v8 = vld [vmem:[%s444_s2] sm:$0xff]  ;;  %v113_v29 = vstv %s445_s3  ;;  %vm150_vm5 = vcmask 261120   ;;  %v197_v49 = vstv %s448_s6  ;;  %s309_s29 = smov [#allocation5]  }
   0x7   :  { %263 = vmatmul.msk.f32.vlgmr.msra.gmra.mxu0 %vm66_vm0, %v38_v6  ;;  %v40_v9 = vld [vmem:[%s443_s1 + $0x10] sm:$0xff]  ;;  %v129_v11 = vld [vmem:[%s447_s5 + $0x18] sm:$0xff]  ;;  %v207_v13 = vld [vmem:[%s449_s7 + $0x8] sm:$0xff]  ;;  %s252_s30 = sshll.u32 %s309_s29, 4  ;;  %s254_s11 = sshll.u32 %s451_s9, 4  ;;  %s253_s30 = int_to_ptr.vmem [resolvable:$true] %s252_s30  ;;  %s255_s11 = int_to_ptr.hbm [resolvable:$true] %s254_s11 }
   0x8   :  { %v128_v10 = vld [vmem:[%s447_s5 + $0x10] sm:$0xff]  ;;  %v41_v12 = vld [vmem:[%s443_s1 + $0x18] sm:$0xff]  ;;  %v126_v15 = vld [vmem:[%s447_s5] sm:$0xff] }
   0x9   :  { %v208_v14 = vld [vmem:[%s449_s7 + $0x10] sm:$0xff]  ;;  %132 = vperm.xlu2 %281, %v126_v15   ;;  %v127_v18 = vld [vmem:[%s447_s5 + $0x8] sm:$0xff]  ;;  %v206_v21 = vld [vmem:[%s449_s7] sm:$0xff] }
   0xa   :  { %58 = vperm.xlu0 %279, %v44_v7   ;;  %v209_v33 = vld [vmem:[%s449_s7 + $0x18] sm:$0xff]  ;;  %v122_v39 = vld [vmem:[%s446_s4] sm:$0xff]  ;;  %v124_v40 = vld [vmem:[%s446_s4 + $0x10] sm:$0xff] }
   0xb   :  { %v123_v42 = vld [vmem:[%s446_s4 + $0x8] sm:$0xff]  ;;  %v125_v43 = vld [vmem:[%s446_s4 + $0x18] sm:$0xff] }
   0xc   :  { %48 = vperm.xlu1 %280, %v42_v8  }
   0xd   :  { %265 = vmatmul.msk.f32.gmra.mxu3 %vm66_vm0, %v40_v9 }
  0x11   :  { %137 = vperm.xlu2 %281, %v127_v18  }
  0x12   :  { %142 = vperm.xlu0 %279, %v128_v10  }
  0x14   :  { %147 = vperm.xlu1 %280, %v129_v11  }
  0x15   :  { %266 = vmatmul.msk.f32.gmra.mxu3 %vm66_vm0, %v41_v12 }
  0x19   :  { %212 = vperm.xlu2 %281, %v206_v21  }
  0x1a   :  { %217 = vperm.xlu0 %279, %v207_v13  }
  0x1c   :  { %222 = vperm.xlu1 %280, %v208_v14  }
  0x21   :  { %227 = vperm.xlu2 %281, %v209_v33  }
  0x63   :  { %v133_v44 = vpop.permute.xlu2 %132 }
  0x6b   :  { %v138_v45 = vpop.permute.xlu2 %137 }
  0x73   :  { %v213_v55 = vpop.permute.xlu2 %212 }
  0x74   :  { %v64_v17 = vpop.permute.xlu0 %63 }
  0x76   :  { %v54_v19 = vpop.permute.xlu1 %53 }
  0x7b   :  { %v228_v7 = vpop.permute.xlu2 %227 }
  0x7c   :  { %v59_v22 = vpop.permute.xlu0 %58 }
  0x7e   :  { %v49_v28 = vpop.permute.xlu1 %48 }
  0x84   :  { %v96_v24 = vpop.f32.mrf.mxu0  ;;  %v143_v47 = vpop.permute.xlu0 %142 }
  0x85   :  { %v97_v30 = vadd.f32 %v96_v24, %v49_v28 }
  0x86   :  { %v148_v51 = vpop.permute.xlu1 %147 }
  0x87   :  { %v114_v37 = vmul.f32 %v113_v29, %v97_v30  ;;  %vm109_vm4 = vcmp.gt.f32.partialorder %v97_v30, 0.0 }
  0x88   :  { %v99_v16 = vpop.f32.mrf.mxu3 }
  0x89   :  { %v100_v26 = vadd.f32 %v99_v16, %v54_v19  ;;  %v118_v41 = vsel %vm109_vm4, %v97_v30, %v114_v37 }
  0x8b   :  { %v115_v35 = vmul.f32 %v113_v29, %v100_v26  ;;  %vm110_vm3 = vcmp.gt.f32.partialorder %v100_v26, 0.0 }
  0x8c   :  { %v218_v60 = vpop.permute.xlu0 %217 }
  0x8d   :  { %v119_v38 = vsel %vm110_vm3, %v100_v26, %v115_v35 }
  0x8e   :  { %v223_v4 = vpop.permute.xlu1 %222 }
  0x90   :  { %v102_v20 = vpop.f32.mrf.mxu3 }
  0x91   :  { %v103_v23 = vadd.f32 %v102_v20, %v59_v22 }
  0x93   :  { %v116_v32 = vmul.f32 %v113_v29, %v103_v23  ;;  %vm111_vm2 = vcmp.gt.f32.partialorder %v103_v23, 0.0 }
  0x95   :  { %v120_v36 = vsel %vm111_vm2, %v103_v23, %v116_v32 }
  0x98   :  { %v105_v25 = vpop.f32.mrf.mxu3 }
  0x99   :  { %v106_v27 = vadd.f32 %v105_v25, %v64_v17  ;;  %v244_v17 = vstv %s450_s8 }
  0x9b   :  { %vm112_vm1 = vcmp.gt.f32.partialorder %v106_v27, 0.0  ;;  %v117_v31 = vmul.f32 %v113_v29, %v106_v27 }
  0x9d   :  { %v121_v34 = vsel %vm112_vm1, %v106_v27, %v117_v31 }
  0x9e   :  { %175 = vmatpush.msra.mxu1 %v121_v34  ;;  %273 = vmatpush.msra.mxu2 %v121_v34 }
  0xa0   :  { %176 = vmatpush.msra.mxu1 %v120_v36  ;;  %274 = vmatpush.msra.mxu2 %v120_v36 }
  0xa2   :  { %177 = vmatpush.msra.mxu1 %v119_v38  ;;  %275 = vmatpush.msra.mxu2 %v119_v38 }
  0xa4   :  { %178 = vmatpush.msra.mxu1 %v118_v41  ;;  %276 = vmatpush.msra.mxu2 %v118_v41 }
  0xa5   :  { %267 = vmatmul.msk.f32.vlgmr.msra.gmra.mxu1 %vm150_vm5, %v122_v39  ;;  %269 = vmatmul.msk.f32.vlgmr.msra.gmra.mxu2 %vm150_vm5, %v124_v40 }
  0xad   :  { %268 = vmatmul.msk.f32.gmra.mxu1 %vm150_vm5, %v123_v42  ;;  %270 = vmatmul.msk.f32.gmra.mxu2 %vm150_vm5, %v125_v43 }
 0x122   :  { %v180_v46 = vpop.f32.mrf.mxu1 }
 0x123   :  { %v181_v48 = vadd.f32 %v180_v46, %v133_v44 }
 0x125   :  { %v198_v52 = vmul.f32 %v197_v49, %v181_v48  ;;  %vm193_vm6 = vcmp.gt.f32.partialorder %v181_v48, 0.0 }
 0x127   :  { %v202_v57 = vsel %vm193_vm6, %v181_v48, %v198_v52 }
 0x128   :  { %v186_v50 = vpop.f32.mrf.mxu2  ;;  %v230_v62 = vmul.f32 %v213_v55, %v202_v57 }
 0x129   :  { %v187_v53 = vadd.f32 %v186_v50, %v143_v47 }
 0x12a   :  { %v183_v54 = vpop.f32.mrf.mxu1 }
 0x12b   :  { %v184_v56 = vadd.f32 %v183_v54, %v138_v45  ;;  %v200_v58 = vmul.f32 %v197_v49, %v187_v53  ;;  %vm195_vm8 = vcmp.gt.f32.partialorder %v187_v53, 0.0 }
 0x12d   :  { %vm194_vm7 = vcmp.gt.f32.partialorder %v184_v56, 0.0  ;;  %v199_v59 = vmul.f32 %v197_v49, %v184_v56  ;;  %v204_v1 = vsel %vm195_vm8, %v187_v53, %v200_v58 }
 0x12e   :  { %v232_v6 = vmul.f32 %v223_v4, %v204_v1 }
 0x12f   :  { %v203_v61 = vsel %vm194_vm7, %v184_v56, %v199_v59 }
 0x130   :  { %v231_v63 = vmul.f32 %v218_v60, %v203_v61  ;;  %v189_v0 = vpop.f32.mrf.mxu2 }
 0x131   :  { %v190_v2 = vadd.f32 %v189_v0, %v148_v51 }
 0x132   :  { %v234_v3 = vadd.f32 %v231_v63, %v230_v62 }
 0x133   :  { %vm196_vm9 = vcmp.gt.f32.partialorder %v190_v2, 0.0  ;;  %v201_v5 = vmul.f32 %v197_v49, %v190_v2 }
 0x134   :  { %v235_v10 = vadd.f32 %v234_v3, %v232_v6 }
 0x135   :  { %v205_v8 = vsel %vm196_vm9, %v190_v2, %v201_v5 }
 0x136   :  { %v233_v9 = vmul.f32 %v228_v7, %v205_v8 }
 0x138   :  { %v236_v11 = vadd.f32 %v235_v10, %v233_v9 }
 0x13a   :  { %v237_v12 = vrot.slane %v236_v11, 4 }
 0x13c   :  { %v238_v13 = vadd.f32 %v237_v12, %v236_v11 }
 0x13e   :  { %v239_v14 = vrot.slane %v238_v13, 2 }
 0x140   :  { %v240_v15 = vadd.f32 %v239_v14, %v238_v13 }
 0x142   :  { %v241_v16 = vrot.slane %v240_v15, 1 }
 0x144   :  { %v242_v18 = vadd.f32 %v241_v16, %v240_v15 }
 0x146   :  { %v245_v19 = vadd.f32 %v244_v17, %v242_v18 }
 0x148   :  { %246 = vst [vmem:[#allocation5] sm:$0x1] %v245_v19 }
 0x149   :  { %257 = dma.vmem_to_hbm [thread:$0]  %s253_s30, 16, %s255_s11, [#allocation6]  }
 0x14a   :  { %306 = dma.done.wait [#allocation6], 16  }
 0x14b   :  { %307 = vsyncadd [#allocation6], 4294967280 }
 0x14c   :  { %262 = vsyncpa [#allocation6], 1 }

</bundles_post_ra>
